<compile_context>
chip_gen: v5e
topology: v5e:2x2
jax: 0.10.0
libtpu: 0.0.40
codegen_flags: <defaults>
</compile_context>

<pallas_src>
import functools

import jax
import jax.numpy as jnp
from jax.experimental import pallas as pl
from jax.experimental.pallas import tpu as pltpu


def _round_up(n, m):
    return ((n + m - 1) // m) * m


def _cdiv(a, b):
    return -(-a // b)


# --------------------------------------------------------------------------- #
# Kernel: one batch tile of the fused MLP forward
# --------------------------------------------------------------------------- #
def _mlp_kernel(num_linear, x_ref, *refs):
    """refs = (W0, b0, W1, b1, ..., W_{L-1}, b_{L-1}, out_ref).

    ReLU after every linear layer except the last (matches the PyTorch
    Sequential).  Matmuls accumulate in f32; hidden activations are cast back
    to the weight dtype so bf16 operands keep hitting the fast MXU path.
    """
    out_ref = refs[-1]
    params = refs[:-1]
    h = x_ref[...]
    for i in range(num_linear):
        w_ref = params[2 * i]
        b_ref = params[2 * i + 1]
        acc = jnp.dot(h, w_ref[...], preferred_element_type=jnp.float32)
        acc = acc + b_ref[...].astype(jnp.float32)  # implicit (1,N)->(TM,N) bcast
        if i < num_linear - 1:
            h = jnp.maximum(acc, 0.0).astype(w_ref.dtype)
        else:
            out_ref[...] = acc.astype(out_ref.dtype)  # narrow (TM, 1) store


# --------------------------------------------------------------------------- #
# One-time parameter preparation (cache the result; do NOT call per forward)
# --------------------------------------------------------------------------- #
def prepare_mlp_params(weights, biases, *, compute_dtype=jnp.float32,
                       hidden_multiple=None):
    """Cast (and, for wide layers only, lane-pad hidden dims of) the params ONCE.

    weights[i]: (in_i, out_i); biases[i]: (1, out_i) or (out_i,).
    The first layer's input width and the last layer's output width stay at
    their native sizes (x is streamed unpadded; the output stays 1 wide).
    Zero padding of hidden dims is ReLU-neutral, so it is numerically exact.
    """
    num_linear = len(weights)
    assert num_linear == len(biases)
    hidden = weights[0].shape[1]
    if hidden_multiple is None:
        # Tiny hidden layers: no padding (the kernel is HBM-bound on x / out).
        # Wide layers: round to 256 lanes for the 2x256^2 v6e/v7x MXU.
        hidden_multiple = 256 if hidden >= 256 else (128 if hidden >= 128 else 1)

    dims_in = [weights[0].shape[0]]
    dims_out = []
    for i, w in enumerate(weights):
        out = w.shape[1]
        if i < num_linear - 1:                       # pad hidden widths only
            out = _round_up(out, hidden_multiple)
        dims_out.append(out)
        if i + 1 < num_linear:
            dims_in.append(out)

    pw, pb = [], []
    for i, (w, b) in enumerate(zip(weights, biases)):
        wi, wo = w.shape
        b2 = jnp.reshape(b, (1, -1))
        if (dims_in[i], dims_out[i]) == (wi, wo):
            pw.append(w.astype(compute_dtype))
            pb.append(b2.astype(compute_dtype))
        else:
            wp = jnp.zeros((dims_in[i], dims_out[i]), compute_dtype)
            pw.append(wp.at[:wi, :wo].set(w.astype(compute_dtype)))
            bp = jnp.zeros((1, dims_out[i]), compute_dtype)
            pb.append(bp.at[:, :wo].set(b2.astype(compute_dtype)))
    return pw, pb


def _vmem_cap_bytes():
    """Per-generation VMEM cap (never exceeds v7x's 64 MiB/TC)."""
    try:
        return int(pltpu.get_tpu_info().vmem_capacity_bytes * 0.85)
    except Exception:
        return 48 << 20   # conservative fallback, safe on v5e/v6e/v7x


# --------------------------------------------------------------------------- #
# Forward wrapper
# --------------------------------------------------------------------------- #
def mlp_forward(x, prep_weights, prep_biases, *, tm=2048):
    """Fused MLP forward with a batch-tiled pallas_call.

    x:            (batch, input_dim) — cast to the prepared param dtype
    prep_weights: output of prepare_mlp_params (cast / padded once, reused)
    prep_biases:  idem
    returns:      (batch, 1) float32
    """
    num_linear = len(prep_weights)
    batch, input_dim = x.shape
    assert prep_weights[0].shape[0] == input_dim
    compute_dtype = prep_weights[0].dtype
    out_dim = prep_weights[-1].shape[1]            # 1 for this module

    # ---- batch tiling: big tiles, even grid length when there is >1 tile ----
    unit = 16 if jnp.dtype(compute_dtype).itemsize == 2 else 8
    tm_eff = max(unit, min(_round_up(tm, unit), _round_up(batch, unit)))
    steps = _cdiv(batch, tm_eff)
    if steps > 1 and steps % 2 == 1:
        # shrink the tile (don't add a whole padded tile) so both v7x TCs work
        tm_eff = max(unit, _round_up(_cdiv(batch, steps + 1), unit))
        steps = _cdiv(batch, tm_eff)
    padded_batch = steps * tm_eff

    xc = x.astype(compute_dtype)
    if padded_batch != batch:                      # pad only the batch remainder
        xc = jnp.pad(xc, ((0, padded_batch - batch), (0, 0)))

    flat_params = []
    for w, b in zip(prep_weights, prep_biases):
        flat_params += [w, b]

    # ---- VMEM budget ---------------------------------------------------------
    dsz = jnp.dtype(compute_dtype).itemsize
    param_bytes = sum(int(p.size) * jnp.dtype(p.dtype).itemsize for p in flat_params)
    max_width = max(max(w.shape[1] for w in prep_weights), input_dim)
    x_tile = tm_eff * input_dim * dsz
    out_tile = tm_eff * out_dim * 4
    act_scratch = 2 * tm_eff * max_width * (4 + dsz)

    def run(single_buffer_params):
        def pspec(shape):
            idx = lambda i, n=len(shape): (0,) * n   # resident across grid steps
            if single_buffer_params:
                return pl.BlockSpec(shape, idx, pipeline_mode=pl.Buffered(1))
            return pl.BlockSpec(shape, idx)

        param_specs = [pspec(p.shape) for p in flat_params]
        pbuf = 1 if single_buffer_params else 2
        vmem_bytes = (2 * (x_tile + out_tile) + pbuf * param_bytes
                      + act_scratch + (2 << 20))
        vmem_bytes = int(min(max(vmem_bytes, 8 << 20), _vmem_cap_bytes()))

        kernel = functools.partial(_mlp_kernel, num_linear)
        return pl.pallas_call(
            kernel,
            out_shape=jax.ShapeDtypeStruct((padded_batch, out_dim), jnp.float32),
            grid=(steps,),
            in_specs=[pl.BlockSpec((tm_eff, input_dim), lambda i: (i, 0))]
            + param_specs,
            out_specs=pl.BlockSpec((tm_eff, out_dim), lambda i: (i, 0)),
            compiler_params=pltpu.CompilerParams(
                dimension_semantics=("parallel",),   # megacore sharding on v7x
                vmem_limit_bytes=vmem_bytes,
            ),
        )(xc, *flat_params)

    try:
        out_padded = run(single_buffer_params=True)
    except Exception:
        # pl.Buffered(1) not accepted by this JAX build -> default double
        # buffering for the resident params (only costs extra VMEM).
        out_padded = run(single_buffer_params=False)

    return out_padded[:batch]


# --------------------------------------------------------------------------- #
# Parameter init + pure-JAX reference (for the self-test)
# --------------------------------------------------------------------------- #
def init_mlp_params(key, input_dim, num_layers, layer_depth):
    """Layer sizes: input_dim -> layer_depth -> ... -> layer_depth -> 1
    (matches MLP.__init__), PyTorch-style uniform(-1/sqrt(fan_in), 1/sqrt(fan_in))."""
    dims = [input_dim] + [layer_depth] * num_layers + [1]
    weights, biases = [], []
    for i in range(len(dims) - 1):
        fan_in, fan_out = dims[i], dims[i + 1]
        key, kw, kb = jax.random.split(key, 3)
        bound = 1.0 / jnp.sqrt(jnp.float32(fan_in))
        weights.append(jax.random.uniform(kw, (fan_in, fan_out), jnp.float32, -bound, bound))
        biases.append(jax.random.uniform(kb, (1, fan_out), jnp.float32, -bound, bound))
    return weights, biases


def mlp_reference(x, weights, biases):
    h = x
    n = len(weights)
    for i in range(n):
        h = h @ weights[i] + biases[i]
        if i < n - 1:
            h = jnp.maximum(h, 0.0)
    return h


if __name__ == "__main__":
    # Small shapes consistent with the module: MLP(seed, input_dim=16,
    # num_layers=3, layer_depth=32, ...)
    batch = 8
    input_dim = 16
    num_layers = 3
    layer_depth = 32

    key = jax.random.PRNGKey(0)
    key, kx = jax.random.split(key)
    x = jax.random.normal(kx, (batch, input_dim), jnp.float32)
    weights, biases = init_mlp_params(key, input_dim, num_layers, layer_depth)

    ref = mlp_reference(x, weights, biases)

    # f32 operand path — params prepared (cast) once and reused across calls.
    pw32, pb32 = prepare_mlp_params(weights, biases, compute_dtype=jnp.float32)
    out_f32 = jax.block_until_ready(mlp_forward(x, pw32, pb32))
    assert out_f32.shape == (batch, 1), out_f32.shape
    assert jnp.allclose(out_f32, ref, atol=1e-5, rtol=1e-5), (out_f32, ref)

    # bf16 operand path (f32 accumulation) — fast MXU path on v6e/v7x.
    pwbf, pbbf = prepare_mlp_params(weights, biases, compute_dtype=jnp.bfloat16)
    out_bf16 = jax.block_until_ready(mlp_forward(x, pwbf, pbbf))
    assert out_bf16.shape == (batch, 1), out_bf16.shape
    assert jnp.allclose(out_bf16, ref, atol=1e-1), (out_bf16, ref)

    print("KERNEL_OK")
</pallas_src>

<mosaic_0001>
module attributes {stable_mosaic.version = 11 : i64} {
  func.func @_mlp_kernel(%arg0: i32, %arg1: memref<8x16xf32, #tpu.memory_space<vmem>>, %arg2: memref<16x32xf32, #tpu.memory_space<vmem>>, %arg3: memref<1x32xf32, #tpu.memory_space<vmem>>, %arg4: memref<32x32xf32, #tpu.memory_space<vmem>>, %arg5: memref<1x32xf32, #tpu.memory_space<vmem>>, %arg6: memref<32x32xf32, #tpu.memory_space<vmem>>, %arg7: memref<1x32xf32, #tpu.memory_space<vmem>>, %arg8: memref<32x1xf32, #tpu.memory_space<vmem>>, %arg9: memref<1x1xf32, #tpu.memory_space<vmem>>, %arg10: memref<8x1xf32, #tpu.memory_space<vmem>>) attributes {dimension_semantics = [#tpu.dimension_semantics<parallel>], iteration_bounds = array<i64: 1>, scalar_prefetch = 0 : i64, scratch_operands = 0 : i64, tpu.core_type = #tpu.core_type<tc>, window_params = [{transform_indices = @transform_0, window_bounds = array<i64: 8, 16>}, {pipeline_mode = #tpu.pipeline_mode<synchronous>, transform_indices = @transform_1, window_bounds = array<i64: 16, 32>}, {pipeline_mode = #tpu.pipeline_mode<synchronous>, transform_indices = @transform_2, window_bounds = array<i64: 1, 32>}, {pipeline_mode = #tpu.pipeline_mode<synchronous>, transform_indices = @transform_3, window_bounds = array<i64: 32, 32>}, {pipeline_mode = #tpu.pipeline_mode<synchronous>, transform_indices = @transform_4, window_bounds = array<i64: 1, 32>}, {pipeline_mode = #tpu.pipeline_mode<synchronous>, transform_indices = @transform_5, window_bounds = array<i64: 32, 32>}, {pipeline_mode = #tpu.pipeline_mode<synchronous>, transform_indices = @transform_6, window_bounds = array<i64: 1, 32>}, {pipeline_mode = #tpu.pipeline_mode<synchronous>, transform_indices = @transform_7, window_bounds = array<i64: 32, 1>}, {pipeline_mode = #tpu.pipeline_mode<synchronous>, transform_indices = @transform_8, window_bounds = array<i64: 1, 1>}, {transform_indices = @transform_9, window_bounds = array<i64: 8, 1>}]} {
    %c0 = arith.constant 0 : index
    %c0_0 = arith.constant 0 : index
    %0 = vector.load %arg1[%c0, %c0_0] : memref<8x16xf32, #tpu.memory_space<vmem>>, vector<8x16xf32>
    %c0_1 = arith.constant 0 : index
    %c0_2 = arith.constant 0 : index
    %1 = vector.load %arg2[%c0_1, %c0_2] : memref<16x32xf32, #tpu.memory_space<vmem>>, vector<16x32xf32>
    %cst = arith.constant dense<0.000000e+00> : vector<8x32xf32>
    %2 = tpu.matmul %0, %1, %cst {dimension_numbers = #tpu.dot_dimension_numbers<[1], [0], [0], [1], [0, 0, 1, 1], [], []>} : vector<8x16xf32>, vector<16x32xf32>, vector<8x32xf32> -> vector<8x32xf32>
    %c0_3 = arith.constant 0 : index
    %c0_4 = arith.constant 0 : index
    %3 = vector.load %arg3[%c0_3, %c0_4] : memref<1x32xf32, #tpu.memory_space<vmem>>, vector<1x32xf32>
    %4 = vector.broadcast %3 : vector<1x32xf32> to vector<8x32xf32>
    %5 = arith.addf %2, %4 : vector<8x32xf32>
    %cst_5 = arith.constant 0.000000e+00 : f32
    %6 = vector.broadcast %cst_5 : f32 to vector<8x32xf32>
    %7 = arith.maximumf %5, %6 : vector<8x32xf32>
    %c0_6 = arith.constant 0 : index
    %c0_7 = arith.constant 0 : index
    %8 = vector.load %arg4[%c0_6, %c0_7] : memref<32x32xf32, #tpu.memory_space<vmem>>, vector<32x32xf32>
    %cst_8 = arith.constant dense<0.000000e+00> : vector<8x32xf32>
    %9 = tpu.matmul %7, %8, %cst_8 {dimension_numbers = #tpu.dot_dimension_numbers<[1], [0], [0], [1], [0, 0, 1, 1], [], []>} : vector<8x32xf32>, vector<32x32xf32>, vector<8x32xf32> -> vector<8x32xf32>
    %c0_9 = arith.constant 0 : index
    %c0_10 = arith.constant 0 : index
    %10 = vector.load %arg5[%c0_9, %c0_10] : memref<1x32xf32, #tpu.memory_space<vmem>>, vector<1x32xf32>
    %11 = vector.broadcast %10 : vector<1x32xf32> to vector<8x32xf32>
    %12 = arith.addf %9, %11 : vector<8x32xf32>
    %cst_11 = arith.constant 0.000000e+00 : f32
    %13 = vector.broadcast %cst_11 : f32 to vector<8x32xf32>
    %14 = arith.maximumf %12, %13 : vector<8x32xf32>
    %c0_12 = arith.constant 0 : index
    %c0_13 = arith.constant 0 : index
    %15 = vector.load %arg6[%c0_12, %c0_13] : memref<32x32xf32, #tpu.memory_space<vmem>>, vector<32x32xf32>
    %cst_14 = arith.constant dense<0.000000e+00> : vector<8x32xf32>
    %16 = tpu.matmul %14, %15, %cst_14 {dimension_numbers = #tpu.dot_dimension_numbers<[1], [0], [0], [1], [0, 0, 1, 1], [], []>} : vector<8x32xf32>, vector<32x32xf32>, vector<8x32xf32> -> vector<8x32xf32>
    %c0_15 = arith.constant 0 : index
    %c0_16 = arith.constant 0 : index
    %17 = vector.load %arg7[%c0_15, %c0_16] : memref<1x32xf32, #tpu.memory_space<vmem>>, vector<1x32xf32>
    %18 = vector.broadcast %17 : vector<1x32xf32> to vector<8x32xf32>
    %19 = arith.addf %16, %18 : vector<8x32xf32>
    %cst_17 = arith.constant 0.000000e+00 : f32
    %20 = vector.broadcast %cst_17 : f32 to vector<8x32xf32>
    %21 = arith.maximumf %19, %20 : vector<8x32xf32>
    %c0_18 = arith.constant 0 : index
    %c0_19 = arith.constant 0 : index
    %22 = vector.load %arg8[%c0_18, %c0_19] : memref<32x1xf32, #tpu.memory_space<vmem>>, vector<32x1xf32>
    %cst_20 = arith.constant dense<0.000000e+00> : vector<8x1xf32>
    %23 = tpu.matmul %21, %22, %cst_20 {dimension_numbers = #tpu.dot_dimension_numbers<[1], [0], [0], [1], [0, 0, 1, 1], [], []>} : vector<8x32xf32>, vector<32x1xf32>, vector<8x1xf32> -> vector<8x1xf32>
    %c0_21 = arith.constant 0 : index
    %c0_22 = arith.constant 0 : index
    %24 = vector.load %arg9[%c0_21, %c0_22] : memref<1x1xf32, #tpu.memory_space<vmem>>, vector<1x1xf32>
    %25 = vector.broadcast %24 : vector<1x1xf32> to vector<8x1xf32>
    %26 = arith.addf %23, %25 : vector<8x1xf32>
    %c0_23 = arith.constant 0 : index
    %c0_24 = arith.constant 0 : index
    %27 = vector.load %arg10[%c0_23, %c0_24] : memref<8x1xf32, #tpu.memory_space<vmem>>, vector<8x1xf32>
    tpu.vector_store %arg10[%c0_23, %c0_24], %26 {strides = array<i32>} : memref<8x1xf32, #tpu.memory_space<vmem>>, vector<8x1xf32>,
    return
  }
  func.func @transform_0(%arg0: i32) -> (i32, i32) {
    %c0_i32 = arith.constant 0 : i32
    %c0_i32_0 = arith.constant 0 : i32
    return %arg0, %c0_i32 : i32, i32
  }
  func.func @transform_1(%arg0: i32) -> (i32, i32) {
    %c0_i32 = arith.constant 0 : i32
    %c0_i32_0 = arith.constant 0 : i32
    %c0_i32_1 = arith.constant 0 : i32
    return %c0_i32, %c0_i32_0 : i32, i32
  }
  func.func @transform_2(%arg0: i32) -> (i32, i32) {
    %c0_i32 = arith.constant 0 : i32
    %c0_i32_0 = arith.constant 0 : i32
    %c0_i32_1 = arith.constant 0 : i32
    return %c0_i32, %c0_i32_0 : i32, i32
  }
  func.func @transform_3(%arg0: i32) -> (i32, i32) {
    %c0_i32 = arith.constant 0 : i32
    %c0_i32_0 = arith.constant 0 : i32
    %c0_i32_1 = arith.constant 0 : i32
    return %c0_i32, %c0_i32_0 : i32, i32
  }
  func.func @transform_4(%arg0: i32) -> (i32, i32) {
    %c0_i32 = arith.constant 0 : i32
    %c0_i32_0 = arith.constant 0 : i32
    %c0_i32_1 = arith.constant 0 : i32
    return %c0_i32, %c0_i32_0 : i32, i32
  }
  func.func @transform_5(%arg0: i32) -> (i32, i32) {
    %c0_i32 = arith.constant 0 : i32
    %c0_i32_0 = arith.constant 0 : i32
    %c0_i32_1 = arith.constant 0 : i32
    return %c0_i32, %c0_i32_0 : i32, i32
  }
  func.func @transform_6(%arg0: i32) -> (i32, i32) {
    %c0_i32 = arith.constant 0 : i32
    %c0_i32_0 = arith.constant 0 : i32
    %c0_i32_1 = arith.constant 0 : i32
    return %c0_i32, %c0_i32_0 : i32, i32
  }
  func.func @transform_7(%arg0: i32) -> (i32, i32) {
    %c0_i32 = arith.constant 0 : i32
    %c0_i32_0 = arith.constant 0 : i32
    %c0_i32_1 = arith.constant 0 : i32
    return %c0_i32, %c0_i32_0 : i32, i32
  }
  func.func @transform_8(%arg0: i32) -> (i32, i32) {
    %c0_i32 = arith.constant 0 : i32
    %c0_i32_0 = arith.constant 0 : i32
    %c0_i32_1 = arith.constant 0 : i32
    return %c0_i32, %c0_i32_0 : i32, i32
  }
  func.func @transform_9(%arg0: i32) -> (i32, i32) {
    %c0_i32 = arith.constant 0 : i32
    %c0_i32_0 = arith.constant 0 : i32
    return %arg0, %c0_i32 : i32, i32
  }
}

module attributes {stable_mosaic.version = 11 : i64} {
  func.func @_mlp_kernel(%arg0: i32, %arg1: memref<8x16xf32, #tpu.memory_space<vmem>>, %arg2: memref<16x32xf32, #tpu.memory_space<vmem>>, %arg3: memref<1x32xf32, #tpu.memory_space<vmem>>, %arg4: memref<32x32xf32, #tpu.memory_space<vmem>>, %arg5: memref<1x32xf32, #tpu.memory_space<vmem>>, %arg6: memref<32x32xf32, #tpu.memory_space<vmem>>, %arg7: memref<1x32xf32, #tpu.memory_space<vmem>>, %arg8: memref<32x1xf32, #tpu.memory_space<vmem>>, %arg9: memref<1x1xf32, #tpu.memory_space<vmem>>, %arg10: memref<8x1xf32, #tpu.memory_space<vmem>>) attributes {dimension_semantics = [#tpu.dimension_semantics<parallel>], iteration_bounds = array<i64: 1>, scalar_prefetch = 0 : i64, scratch_operands = 0 : i64, tpu.core_type = #tpu.core_type<tc>, window_params = [{transform_indices = @transform_0, window_bounds = array<i64: 8, 16>}, {pipeline_mode = #tpu.pipeline_mode<synchronous>, transform_indices = @transform_1, window_bounds = array<i64: 16, 32>}, {pipeline_mode = #tpu.pipeline_mode<synchronous>, transform_indices = @transform_2, window_bounds = array<i64: 1, 32>}, {pipeline_mode = #tpu.pipeline_mode<synchronous>, transform_indices = @transform_3, window_bounds = array<i64: 32, 32>}, {pipeline_mode = #tpu.pipeline_mode<synchronous>, transform_indices = @transform_4, window_bounds = array<i64: 1, 32>}, {pipeline_mode = #tpu.pipeline_mode<synchronous>, transform_indices = @transform_5, window_bounds = array<i64: 32, 32>}, {pipeline_mode = #tpu.pipeline_mode<synchronous>, transform_indices = @transform_6, window_bounds = array<i64: 1, 32>}, {pipeline_mode = #tpu.pipeline_mode<synchronous>, transform_indices = @transform_7, window_bounds = array<i64: 32, 1>}, {pipeline_mode = #tpu.pipeline_mode<synchronous>, transform_indices = @transform_8, window_bounds = array<i64: 1, 1>}, {transform_indices = @transform_9, window_bounds = array<i64: 8, 1>}]} {
    %c0 = arith.constant 0 : index
    %c0_0 = arith.constant 0 : index
    %0 = vector.load %arg1[%c0, %c0_0] : memref<8x16xf32, #tpu.memory_space<vmem>>, vector<8x16xf32>
    %c0_1 = arith.constant 0 : index
    %c0_2 = arith.constant 0 : index
    %1 = vector.load %arg2[%c0_1, %c0_2] : memref<16x32xf32, #tpu.memory_space<vmem>>, vector<16x32xf32>
    %cst = arith.constant dense<0.000000e+00> : vector<8x32xf32>
    %2 = tpu.matmul %0, %1, %cst {dimension_numbers = #tpu.dot_dimension_numbers<[1], [0], [0], [1], [0, 0, 1, 1], [], []>} : vector<8x16xf32>, vector<16x32xf32>, vector<8x32xf32> -> vector<8x32xf32>
    %c0_3 = arith.constant 0 : index
    %c0_4 = arith.constant 0 : index
    %3 = vector.load %arg3[%c0_3, %c0_4] : memref<1x32xf32, #tpu.memory_space<vmem>>, vector<1x32xf32>
    %4 = vector.broadcast %3 : vector<1x32xf32> to vector<8x32xf32>
    %5 = arith.addf %2, %4 : vector<8x32xf32>
    %cst_5 = arith.constant 0.000000e+00 : f32
    %6 = vector.broadcast %cst_5 : f32 to vector<8x32xf32>
    %7 = arith.maximumf %5, %6 : vector<8x32xf32>
    %c0_6 = arith.constant 0 : index
    %c0_7 = arith.constant 0 : index
    %8 = vector.load %arg4[%c0_6, %c0_7] : memref<32x32xf32, #tpu.memory_space<vmem>>, vector<32x32xf32>
    %cst_8 = arith.constant dense<0.000000e+00> : vector<8x32xf32>
    %9 = tpu.matmul %7, %8, %cst_8 {dimension_numbers = #tpu.dot_dimension_numbers<[1], [0], [0], [1], [0, 0, 1, 1], [], []>} : vector<8x32xf32>, vector<32x32xf32>, vector<8x32xf32> -> vector<8x32xf32>
    %c0_9 = arith.constant 0 : index
    %c0_10 = arith.constant 0 : index
    %10 = vector.load %arg5[%c0_9, %c0_10] : memref<1x32xf32, #tpu.memory_space<vmem>>, vector<1x32xf32>
    %11 = vector.broadcast %10 : vector<1x32xf32> to vector<8x32xf32>
    %12 = arith.addf %9, %11 : vector<8x32xf32>
    %cst_11 = arith.constant 0.000000e+00 : f32
    %13 = vector.broadcast %cst_11 : f32 to vector<8x32xf32>
    %14 = arith.maximumf %12, %13 : vector<8x32xf32>
    %c0_12 = arith.constant 0 : index
    %c0_13 = arith.constant 0 : index
    %15 = vector.load %arg6[%c0_12, %c0_13] : memref<32x32xf32, #tpu.memory_space<vmem>>, vector<32x32xf32>
    %cst_14 = arith.constant dense<0.000000e+00> : vector<8x32xf32>
    %16 = tpu.matmul %14, %15, %cst_14 {dimension_numbers = #tpu.dot_dimension_numbers<[1], [0], [0], [1], [0, 0, 1, 1], [], []>} : vector<8x32xf32>, vector<32x32xf32>, vector<8x32xf32> -> vector<8x32xf32>
    %c0_15 = arith.constant 0 : index
    %c0_16 = arith.constant 0 : index
    %17 = vector.load %arg7[%c0_15, %c0_16] : memref<1x32xf32, #tpu.memory_space<vmem>>, vector<1x32xf32>
    %18 = vector.broadcast %17 : vector<1x32xf32> to vector<8x32xf32>
    %19 = arith.addf %16, %18 : vector<8x32xf32>
    %cst_17 = arith.constant 0.000000e+00 : f32
    %20 = vector.broadcast %cst_17 : f32 to vector<8x32xf32>
    %21 = arith.maximumf %19, %20 : vector<8x32xf32>
    %c0_18 = arith.constant 0 : index
    %c0_19 = arith.constant 0 : index
    %22 = vector.load %arg8[%c0_18, %c0_19] : memref<32x1xf32, #tpu.memory_space<vmem>>, vector<32x1xf32>
    %cst_20 = arith.constant dense<0.000000e+00> : vector<8x1xf32>
    %23 = tpu.matmul %21, %22, %cst_20 {dimension_numbers = #tpu.dot_dimension_numbers<[1], [0], [0], [1], [0, 0, 1, 1], [], []>} : vector<8x32xf32>, vector<32x1xf32>, vector<8x1xf32> -> vector<8x1xf32>
    %c0_21 = arith.constant 0 : index
    %c0_22 = arith.constant 0 : index
    %24 = vector.load %arg9[%c0_21, %c0_22] : memref<1x1xf32, #tpu.memory_space<vmem>>, vector<1x1xf32>
    %25 = vector.broadcast %24 : vector<1x1xf32> to vector<8x1xf32>
    %26 = arith.addf %23, %25 : vector<8x1xf32>
    %c0_23 = arith.constant 0 : index
    %c0_24 = arith.constant 0 : index
    %27 = vector.load %arg10[%c0_23, %c0_24] : memref<8x1xf32, #tpu.memory_space<vmem>>, vector<8x1xf32>
    tpu.vector_store %arg10[%c0_23, %c0_24], %26 {strides = array<i32>} : memref<8x1xf32, #tpu.memory_space<vmem>>, vector<8x1xf32>,
    return
  }
  func.func @transform_0(%arg0: i32) -> (i32, i32) {
    %c0_i32 = arith.constant 0 : i32
    %c0_i32_0 = arith.constant 0 : i32
    return %arg0, %c0_i32 : i32, i32
  }
  func.func @transform_1(%arg0: i32) -> (i32, i32) {
    %c0_i32 = arith.constant 0 : i32
    %c0_i32_0 = arith.constant 0 : i32
    %c0_i32_1 = arith.constant 0 : i32
    return %c0_i32, %c0_i32_0 : i32, i32
  }
  func.func @transform_2(%arg0: i32) -> (i32, i32) {
    %c0_i32 = arith.constant 0 : i32
    %c0_i32_0 = arith.constant 0 : i32
    %c0_i32_1 = arith.constant 0 : i32
    return %c0_i32, %c0_i32_0 : i32, i32
  }
  func.func @transform_3(%arg0: i32) -> (i32, i32) {
    %c0_i32 = arith.constant 0 : i32
    %c0_i32_0 = arith.constant 0 : i32
    %c0_i32_1 = arith.constant 0 : i32
    return %c0_i32, %c0_i32_0 : i32, i32
  }
  func.func @transform_4(%arg0: i32) -> (i32, i32) {
    %c0_i32 = arith.constant 0 : i32
    %c0_i32_0 = arith.constant 0 : i32
    %c0_i32_1 = arith.constant 0 : i32
    return %c0_i32, %c0_i32_0 : i32, i32
  }
  func.func @transform_5(%arg0: i32) -> (i32, i32) {
    %c0_i32 = arith.constant 0 : i32
    %c0_i32_0 = arith.constant 0 : i32
    %c0_i32_1 = arith.constant 0 : i32
    return %c0_i32, %c0_i32_0 : i32, i32
  }
  func.func @transform_6(%arg0: i32) -> (i32, i32) {
    %c0_i32 = arith.constant 0 : i32
    %c0_i32_0 = arith.constant 0 : i32
    %c0_i32_1 = arith.constant 0 : i32
    return %c0_i32, %c0_i32_0 : i32, i32
  }
  func.func @transform_7(%arg0: i32) -> (i32, i32) {
    %c0_i32 = arith.constant 0 : i32
    %c0_i32_0 = arith.constant 0 : i32
    %c0_i32_1 = arith.constant 0 : i32
    return %c0_i32, %c0_i32_0 : i32, i32
  }
  func.func @transform_8(%arg0: i32) -> (i32, i32) {
    %c0_i32 = arith.constant 0 : i32
    %c0_i32_0 = arith.constant 0 : i32
    %c0_i32_1 = arith.constant 0 : i32
    return %c0_i32, %c0_i32_0 : i32, i32
  }
  func.func @transform_9(%arg0: i32) -> (i32, i32) {
    %c0_i32 = arith.constant 0 : i32
    %c0_i32_0 = arith.constant 0 : i32
    return %arg0, %c0_i32 : i32, i32
  }
}

</mosaic_0001>

<bundles_post_ra>
// kernel: tpu_custom_call.1
= control target key start
LH: loop header
LB: loop body
LE: loop exit
PB: predicated region body
PF: predicated region fallthrough
CT: control target
= control target key end

     0   :  { %s410_s0 = inlined_call_operand.hbm [shape: f32[8,16], index: 0, kind: input, shape index: {}]   ;;  %s411_s1 = inlined_call_operand.hbm [shape: f32[16,32], index: 1, kind: input, shape index: {}]   ;;  %s412_s2 = inlined_call_operand.vmem [shape: f32[1,32], index: 2, kind: input, shape index: {}]   ;;  %s413_s3 = inlined_call_operand.vmem [shape: f32[32,32], index: 3, kind: input, shape index: {}]   ;;  %s414_s4 = inlined_call_operand.vmem [shape: f32[1,32], index: 4, kind: input, shape index: {}]   ;;  %s415_s5 = inlined_call_operand.hbm [shape: f32[32,32], index: 5, kind: input, shape index: {}]   ;;  %s416_s6 = inlined_call_operand.vmem [shape: f32[1,32], index: 6, kind: input, shape index: {}]   ;;  %s417_s7 = inlined_call_operand.vmem [shape: f32[32,1], index: 7, kind: input, shape index: {}]   ;;  %s418_s8 = inlined_call_operand.<no memory space> [shape: f32[1,1], index: 8, kind: input, shape index: {}]   ;;  %s419_s9 = inlined_call_operand.vmem [shape: f32[8,1], index: 9, kind: output, shape index: {}]  }
   0x1   :  { %v14_v0 = vstv %s418_s8 }
   0x2   :  { %15 = vst [vmem:[#allocation2] sm:$0x1] %v14_v0 }
   0x3   :  { %16 = vsyncpa [#allocation4], 0 }
   0x4   :  { %17 = vsyncpa [#allocation6], 0  ;;  %s33_s13 = sshll.u32 %s411_s1, 4  ;;  %s304_s14 = smov [#allocation5]   ;;  %s34_s13 = int_to_ptr.hbm [resolvable:$true] %s33_s13 }
   0x5   :  { %s35_s15 = sshll.u32 %s304_s14, 4  ;;  %s23_s18 = sshll.u32 %s410_s0, 4  ;;  %s36_s15 = int_to_ptr.vmem [resolvable:$true] %s35_s15  ;;  %s24_s18 = int_to_ptr.hbm [resolvable:$true] %s23_s18 }
   0x6   :  { %s305_s19 = smov 128   ;;  %s306_s20 = smov 8  }
   0x7   :  { %41 = dma.hbm_to_vmem [thread:$0]  %s34_s13, 256, %s36_s15, [#allocation6], %s305_s19, %s305_s19, %s306_s20  }
   0x8   :  { %s307_s8 = smov [#allocation3]   ;;  %s52_s24 = sshll.u32 %s415_s5, 4  ;;  %s53_s24 = int_to_ptr.hbm [resolvable:$true] %s52_s24 }
   0x9   :  { %s25_s21 = sshll.u32 %s307_s8, 4  ;;  %s308_s1 = smov [#allocation7]   ;;  %s26_s21 = int_to_ptr.vmem [resolvable:$true] %s25_s21 }
   0xa   :  { %28 = dma.hbm_to_vmem [thread:$0]  %s24_s18, 128, %s26_s21, [#allocation4]  }
   0xb   :  { %s54_s25 = sshll.u32 %s308_s1, 4  ;;  %s55_s25 = int_to_ptr.vmem [resolvable:$true] %s54_s25 }
   0xc   :  { %60 = dma.hbm_to_vmem [thread:$0]  %s53_s24, 512, %s55_s25, [#allocation6], %s305_s19, %s305_s19, %s306_s20  }
   0xd   :  { %300 = dma.done.wait [#allocation4], 128  }
   0xe   :  { %301 = vsyncadd [#allocation4], 4294967168 }
   0xf   :  { %302 = dma.done.wait [#allocation6], 768  }
  0x10   :  { %303 = vsyncadd [#allocation6], 4294966528  ;;  %v81_v1 = vld [vmem:[#allocation5 + $0x8] sm:$0xff]  ;;  %v80_v2 = vld [vmem:[#allocation5] sm:$0xff]  ;;  %vm86_vm0 = vcmask 130048   ;;  %vm119_vm1 = vcmask 261120  }
  0x11   :  { %104 = vmatpush.msra.mxu0 %v81_v1  ;;  %v79_v3 = vld [vmem:[#allocation3] sm:$0xff]  ;;  %v114_v4 = vld [vmem:[%s413_s3 + $0x18] sm:$0xff]  ;;  %v113_v5 = vld [vmem:[%s413_s3 + $0x10] sm:$0xff]  ;;  %vm207_vm2 = vcmask 7168  }
  0x12   :  { %135 = vmatpush.msra.mxu1 %v114_v4  ;;  %v112_v6 = vld [vmem:[%s413_s3 + $0x8] sm:$0xff]  ;;  %v111_v7 = vld [vmem:[%s413_s3] sm:$0xff]  ;;  %v147_v8 = vld [vmem:[#allocation7 + $0x18] sm:$0xff] }
  0x13   :  { %105 = vmatpush.msra.mxu0 %v80_v2  ;;  %167 = vmatpush.msra.mxu2 %v147_v8  ;;  %v224_v9 = vld [vmem:[%s412_s2] ss:$0 sm:$0xff]  ;;  %v146_v13 = vld [vmem:[#allocation7 + $0x10] sm:$0xff]  ;;  %v145_v14 = vld [vmem:[#allocation7 + $0x8] sm:$0xff] }
  0x14   :  { %215 = vmatmul.msk.f32.vlgmr.msra.gmra.mxu0 %vm86_vm0, %v79_v3  ;;  %136 = vmatpush.msra.mxu1 %v113_v5  ;;  %v144_v15 = vld [vmem:[#allocation7] sm:$0xff]  ;;  %v178_v21 = vld [vmem:[%s417_s7 + $0x10] sm:$0xff]  ;;  %v177_v22 = vld [vmem:[%s417_s7 + $0x8] sm:$0xff] }
  0x15   :  { %168 = vmatpush.msra.mxu2 %v146_v13  ;;  %v179_v16 = vld [vmem:[%s417_s7 + $0x18] sm:$0xff]  ;;  %v225_v17 = vld [vmem:[%s414_s4] ss:$0 sm:$0xff] }
  0x16   :  { %137 = vmatpush.msra.mxu1 %v112_v6  ;;  %199 = vmatpush.msra.mxu3 %v179_v16  ;;  %v176_v23 = vld [vmem:[%s417_s7] sm:$0xff] }
  0x17   :  { %169 = vmatpush.msra.mxu2 %v145_v14  ;;  %v226_v24 = vld [vmem:[%s416_s6] ss:$0 sm:$0xff] }
  0x18   :  { %138 = vmatpush.msra.mxu1 %v111_v7  ;;  %200 = vmatpush.msra.mxu3 %v178_v21  ;;  %v227_v28 = vld [vmem:[#allocation2] ss:$0 sm:$0xff] }
  0x19   :  { %170 = vmatpush.msra.mxu2 %v144_v15 }
  0x1a   :  { %201 = vmatpush.msra.mxu3 %v177_v22 }
  0x1c   :  { %202 = vmatpush.msra.mxu3 %v176_v23 }
  0x91   :  { %v107_v10 = vpop.f32.mrf.mxu0 }
  0x92   :  { %v108_v11 = vadd.f32 %v224_v9, %v107_v10 }
  0x94   :  { %v110_v12 = vmax.f32 %v108_v11, 0.0 }
  0x96   :  { %216 = vmatmul.msk.f32.vlgmr.msra.gmra.mxu1 %vm119_vm1, %v110_v12 }
 0x113   :  { %v140_v18 = vpop.f32.mrf.mxu1 }
 0x114   :  { %v141_v19 = vadd.f32 %v225_v17, %v140_v18 }
 0x116   :  { %v143_v20 = vmax.f32 %v141_v19, 0.0 }
 0x118   :  { %217 = vmatmul.msk.f32.vlgmr.msra.gmra.mxu2 %vm119_vm1, %v143_v20 }
 0x19b   :  { %v172_v25 = vpop.f32.mrf.mxu2 }
 0x19c   :  { %v173_v26 = vadd.f32 %v226_v24, %v172_v25 }
 0x19e   :  { %v175_v27 = vmax.f32 %v173_v26, 0.0 }
 0x1a0   :  { %218 = vmatmul.msk.f32.vlgmr.msra.gmra.mxu3 %vm119_vm1, %v175_v27 }
 0x223   :  { %v204_v29 = vpop.f32.mrf.mxu3 }
 0x224   :  { %v205_v30 = vadd.f32 %v227_v28, %v204_v29 }
 0x226   :  { %208 = vst.msk [vmem:[%s419_s9] sm:$0xff] %vm207_vm2, %v205_v30 }
 0x227   :  { %213 = vsyncpa [#allocation4], 1 }
 0x228   :  { %214 = vsyncpa [#allocation6], 1 }

// kernel: tpu_custom_call.1
= control target key start
LH: loop header
LB: loop body
LE: loop exit
PB: predicated region body
PF: predicated region fallthrough
CT: control target
= control target key end

     0   :  { %s410_s0 = inlined_call_operand.hbm [shape: f32[8,16], index: 0, kind: input, shape index: {}]   ;;  %s411_s1 = inlined_call_operand.hbm [shape: f32[16,32], index: 1, kind: input, shape index: {}]   ;;  %s412_s2 = inlined_call_operand.vmem [shape: f32[1,32], index: 2, kind: input, shape index: {}]   ;;  %s413_s3 = inlined_call_operand.vmem [shape: f32[32,32], index: 3, kind: input, shape index: {}]   ;;  %s414_s4 = inlined_call_operand.vmem [shape: f32[1,32], index: 4, kind: input, shape index: {}]   ;;  %s415_s5 = inlined_call_operand.hbm [shape: f32[32,32], index: 5, kind: input, shape index: {}]   ;;  %s416_s6 = inlined_call_operand.vmem [shape: f32[1,32], index: 6, kind: input, shape index: {}]   ;;  %s417_s7 = inlined_call_operand.vmem [shape: f32[32,1], index: 7, kind: input, shape index: {}]   ;;  %s418_s8 = inlined_call_operand.<no memory space> [shape: f32[1,1], index: 8, kind: input, shape index: {}]   ;;  %s419_s9 = inlined_call_operand.vmem [shape: f32[8,1], index: 9, kind: output, shape index: {}]  }
   0x1   :  { %v14_v0 = vstv %s418_s8 }
   0x2   :  { %15 = vst [vmem:[#allocation2] sm:$0x1] %v14_v0 }
   0x3   :  { %16 = vsyncpa [#allocation4], 0 }
   0x4   :  { %17 = vsyncpa [#allocation6], 0  ;;  %s33_s13 = sshll.u32 %s411_s1, 4  ;;  %s304_s14 = smov [#allocation5]   ;;  %s34_s13 = int_to_ptr.hbm [resolvable:$true] %s33_s13 }
   0x5   :  { %s35_s15 = sshll.u32 %s304_s14, 4  ;;  %s23_s18 = sshll.u32 %s410_s0, 4  ;;  %s36_s15 = int_to_ptr.vmem [resolvable:$true] %s35_s15  ;;  %s24_s18 = int_to_ptr.hbm [resolvable:$true] %s23_s18 }
   0x6   :  { %s305_s19 = smov 128   ;;  %s306_s20 = smov 8  }
   0x7   :  { %41 = dma.hbm_to_vmem [thread:$0]  %s34_s13, 256, %s36_s15, [#allocation6], %s305_s19, %s305_s19, %s306_s20  }
   0x8   :  { %s307_s8 = smov [#allocation3]   ;;  %s52_s24 = sshll.u32 %s415_s5, 4  ;;  %s53_s24 = int_to_ptr.hbm [resolvable:$true] %s52_s24 }
   0x9   :  { %s25_s21 = sshll.u32 %s307_s8, 4  ;;  %s308_s1 = smov [#allocation7]   ;;  %s26_s21 = int_to_ptr.vmem [resolvable:$true] %s25_s21 }
   0xa   :  { %28 = dma.hbm_to_vmem [thread:$0]  %s24_s18, 128, %s26_s21, [#allocation4]  }
   0xb   :  { %s54_s25 = sshll.u32 %s308_s1, 4  ;;  %s55_s25 = int_to_ptr.vmem [resolvable:$true] %s54_s25 }
   0xc   :  { %60 = dma.hbm_to_vmem [thread:$0]  %s53_s24, 512, %s55_s25, [#allocation6], %s305_s19, %s305_s19, %s306_s20  }
   0xd   :  { %300 = dma.done.wait [#allocation4], 128  }
   0xe   :  { %301 = vsyncadd [#allocation4], 4294967168 }
   0xf   :  { %302 = dma.done.wait [#allocation6], 768  }
  0x10   :  { %303 = vsyncadd [#allocation6], 4294966528  ;;  %v81_v1 = vld [vmem:[#allocation5 + $0x8] sm:$0xff]  ;;  %v80_v2 = vld [vmem:[#allocation5] sm:$0xff]  ;;  %vm86_vm0 = vcmask 130048   ;;  %vm119_vm1 = vcmask 261120  }
  0x11   :  { %104 = vmatpush.msra.mxu0 %v81_v1  ;;  %v79_v3 = vld [vmem:[#allocation3] sm:$0xff]  ;;  %v114_v4 = vld [vmem:[%s413_s3 + $0x18] sm:$0xff]  ;;  %v113_v5 = vld [vmem:[%s413_s3 + $0x10] sm:$0xff]  ;;  %vm207_vm2 = vcmask 7168  }
  0x12   :  { %135 = vmatpush.msra.mxu1 %v114_v4  ;;  %v112_v6 = vld [vmem:[%s413_s3 + $0x8] sm:$0xff]  ;;  %v111_v7 = vld [vmem:[%s413_s3] sm:$0xff]  ;;  %v147_v8 = vld [vmem:[#allocation7 + $0x18] sm:$0xff] }
  0x13   :  { %105 = vmatpush.msra.mxu0 %v80_v2  ;;  %167 = vmatpush.msra.mxu2 %v147_v8  ;;  %v224_v9 = vld [vmem:[%s412_s2] ss:$0 sm:$0xff]  ;;  %v146_v13 = vld [vmem:[#allocation7 + $0x10] sm:$0xff]  ;;  %v145_v14 = vld [vmem:[#allocation7 + $0x8] sm:$0xff] }
  0x14   :  { %215 = vmatmul.msk.f32.vlgmr.msra.gmra.mxu0 %vm86_vm0, %v79_v3  ;;  %136 = vmatpush.msra.mxu1 %v113_v5  ;;  %v144_v15 = vld [vmem:[#allocation7] sm:$0xff]  ;;  %v178_v21 = vld [vmem:[%s417_s7 + $0x10] sm:$0xff]  ;;  %v177_v22 = vld [vmem:[%s417_s7 + $0x8] sm:$0xff] }
  0x15   :  { %168 = vmatpush.msra.mxu2 %v146_v13  ;;  %v179_v16 = vld [vmem:[%s417_s7 + $0x18] sm:$0xff]  ;;  %v225_v17 = vld [vmem:[%s414_s4] ss:$0 sm:$0xff] }
  0x16   :  { %137 = vmatpush.msra.mxu1 %v112_v6  ;;  %199 = vmatpush.msra.mxu3 %v179_v16  ;;  %v176_v23 = vld [vmem:[%s417_s7] sm:$0xff] }
  0x17   :  { %169 = vmatpush.msra.mxu2 %v145_v14  ;;  %v226_v24 = vld [vmem:[%s416_s6] ss:$0 sm:$0xff] }
  0x18   :  { %138 = vmatpush.msra.mxu1 %v111_v7  ;;  %200 = vmatpush.msra.mxu3 %v178_v21  ;;  %v227_v28 = vld [vmem:[#allocation2] ss:$0 sm:$0xff] }
  0x19   :  { %170 = vmatpush.msra.mxu2 %v144_v15 }
  0x1a   :  { %201 = vmatpush.msra.mxu3 %v177_v22 }
  0x1c   :  { %202 = vmatpush.msra.mxu3 %v176_v23 }
  0x91   :  { %v107_v10 = vpop.f32.mrf.mxu0 }
  0x92   :  { %v108_v11 = vadd.f32 %v224_v9, %v107_v10 }
  0x94   :  { %v110_v12 = vmax.f32 %v108_v11, 0.0 }
  0x96   :  { %216 = vmatmul.msk.f32.vlgmr.msra.gmra.mxu1 %vm119_vm1, %v110_v12 }
 0x113   :  { %v140_v18 = vpop.f32.mrf.mxu1 }
 0x114   :  { %v141_v19 = vadd.f32 %v225_v17, %v140_v18 }
 0x116   :  { %v143_v20 = vmax.f32 %v141_v19, 0.0 }
 0x118   :  { %217 = vmatmul.msk.f32.vlgmr.msra.gmra.mxu2 %vm119_vm1, %v143_v20 }
 0x19b   :  { %v172_v25 = vpop.f32.mrf.mxu2 }
 0x19c   :  { %v173_v26 = vadd.f32 %v226_v24, %v172_v25 }
 0x19e   :  { %v175_v27 = vmax.f32 %v173_v26, 0.0 }
 0x1a0   :  { %218 = vmatmul.msk.f32.vlgmr.msra.gmra.mxu3 %vm119_vm1, %v175_v27 }
 0x223   :  { %v204_v29 = vpop.f32.mrf.mxu3 }
 0x224   :  { %v205_v30 = vadd.f32 %v227_v28, %v204_v29 }
 0x226   :  { %208 = vst.msk [vmem:[%s419_s9] sm:$0xff] %vm207_vm2, %v205_v30 }
 0x227   :  { %213 = vsyncpa [#allocation4], 1 }
 0x228   :  { %214 = vsyncpa [#allocation6], 1 }

</bundles_post_ra>
